<compile_context>
chip_gen: v7x
topology: tpu7x:2x2x1
jax: 0.10.0
libtpu: 0.0.40
codegen_flags: <defaults>
</compile_context>

<pallas_src>
import functools
import math

import jax
import jax.numpy as jnp
from jax import lax
from jax.experimental import pallas as pl
from jax.experimental.pallas import tpu as pltpu

EMBED = 32
HEADS = 4
HEAD_DIM = EMBED // HEADS
SEQ = 8
BATCH = 2
LN_EPS = 1e-5


def _sab_kernel(qkv_ref, wpack_ref, out_ref, *, N, L, H, E):
    """Whole batch in one invocation (no grid).

    qkv_ref  : (3, N*L, E) raw token rows, order = (sa_keys, sa_queries, sa_values)
               after the block's key/query argument swap; qkv[2] doubles as the residual.
    wpack_ref: (3*E + H*E + 8, H*E) packed constants:
                 rows [0, 3E)            : block-diagonal (E, H*E) proj weights for K, Q, V
                                           (Q block pre-scaled by 1/sqrt(head_dim))
                 rows [3E, 3E+HE), :E    : (1/H) * vstack([Wd^T]*H)   (head-mean folded)
                 rows [3E+HE, 3E+HE+3),:E: dense bias, LN gamma, LN beta
    out_ref  : (N*L, E)
    """
    x = qkv_ref[...]                                         # (3, N*L, E)

    # --- fused per-head projections: ONE batched, lane-dense matmul (block-diag weights) ---
    wproj = wpack_ref[0:3 * E, :].reshape(3, E, H * E)       # (3, E, H*E)
    proj = jnp.einsum('bxe,bef->bxf', x, wproj,
                      preferred_element_type=jnp.float32)    # (3, N*L, H*E)

    # Regroup heads from lanes into the batch dim (tiny VMEM-local copies).
    def heads_to_batch(p2):                                  # (N*L, H*E) -> (H*N, L, E)
        p3 = p2.reshape(N, L, H * E)
        return jnp.concatenate(
            [p3[:, :, h * E:(h + 1) * E] for h in range(H)], axis=0)

    kp = heads_to_batch(proj[0])   # SelfAttention keys    (projected block queries)
    qp = heads_to_batch(proj[1])   # SelfAttention queries (projected block keys), pre-scaled
    vp = heads_to_batch(proj[2])   # SelfAttention values

    # --- scores + single fused softmax over all (head, batch) pairs ---
    # NOTE: mask intentionally ignored (out-of-place masked_fill result discarded in source).
    s = jnp.einsum('bqe,bke->bqk', qp, kp,
                   preferred_element_type=jnp.float32)       # (H*N, L, L)
    s = s - jnp.max(s, axis=-1, keepdims=True)
    p = jnp.exp(s)
    attn = p * pl.reciprocal(jnp.sum(p, axis=-1, keepdims=True), approx=True)

    o = jnp.einsum('bqk,bke->bqe', attn, vp,
                   preferred_element_type=jnp.float32)       # (H*N, L, E)

    # Heads back into lanes -> (N*L, H*E); the mean over heads is folded into wdense (K=128).
    o_lanes = jnp.concatenate(
        [o[h * N:(h + 1) * N].reshape(N * L, E) for h in range(H)], axis=-1)  # (N*L, H*E)

    wdense = wpack_ref[3 * E:3 * E + H * E, 0:E]             # (H*E, E), includes 1/H
    vecs = wpack_ref[3 * E + H * E:3 * E + H * E + 3, 0:E]   # (3, E)
    bd, gamma, beta = vecs[0:1], vecs[1:2], vecs[2:3]        # (1, E) each

    dense = jnp.dot(o_lanes, wdense, preferred_element_type=jnp.float32) + bd  # (N*L, E)

    # TODO(synk): nn.Dropout is stochastic in training; implemented as identity (eval mode).
    y = dense + x[2]                                         # residual = block `values`
    mu = jnp.mean(y, axis=-1, keepdims=True)
    var = jnp.mean((y - mu) ** 2, axis=-1, keepdims=True)
    out_ref[...] = (y - mu) * lax.rsqrt(var + LN_EPS) * gamma + beta


@jax.jit
def self_attention_block(keys, queries, values, wpack, mask=None):
    """keys/queries/values: (N, L, E). wpack: packed constants from pack_params()."""
    del mask  # no-op in the reference module (out-of-place masked_fill result is discarded)
    N, L, E = keys.shape
    H = HEADS

    # SelfAttentionBlock.forward calls attention(queries, keys, values):
    #   sa_keys = block queries, sa_queries = block keys, sa_values = block values.
    # No transposes: raw token rows only (free reshapes + one stack).
    qkv = jnp.stack([queries.reshape(N * L, E),
                     keys.reshape(N * L, E),
                     values.reshape(N * L, E)])              # (3, N*L, E)

    kernel = functools.partial(_sab_kernel, N=N, L=L, H=H, E=E)
    vmem = pl.BlockSpec(memory_space=pltpu.MemorySpace.VMEM)

    out = pl.pallas_call(
        kernel,
        out_shape=jax.ShapeDtypeStruct((N * L, E), jnp.float32),
        in_specs=[vmem, vmem],
        out_specs=vmem,
    )(qkv, wpack)
    return out.reshape(N, L, E)   # metadata-only reshape back to the module's layout


def pack_params(Wk, Wq, Wv, Wd, bd, gamma, beta):
    """Build the single packed constants operand (one-time, at init)."""
    E, D, H = EMBED, HEAD_DIM, HEADS
    scale = 1.0 / math.sqrt(D)

    def block_diag(Wt):  # Wt = W.T of shape (D, E) -> block-diagonal (E, H*E)
        m = jnp.zeros((E, H * E), jnp.float32)
        for h in range(H):
            m = m.at[h * D:(h + 1) * D, h * E:(h + 1) * E].set(Wt)
        return m

    wproj = jnp.stack([block_diag(Wk.T),            # SA keys    (block queries)
                       block_diag(Wq.T * scale),    # SA queries (block keys), score scale folded
                       block_diag(Wv.T)])           # SA values
    wdense = jnp.concatenate([Wd.T] * H, axis=0) / H          # (H*E, E), head-mean folded
    vecs = jnp.stack([bd, gamma, beta])                        # (3, E)

    rows = 3 * E + H * E + 8                                   # 232 (multiple of 8)
    wpack = jnp.zeros((rows, H * E), jnp.float32)
    wpack = wpack.at[0:3 * E, :].set(wproj.reshape(3 * E, H * E))
    wpack = wpack.at[3 * E:3 * E + H * E, 0:E].set(wdense)
    wpack = wpack.at[3 * E + H * E:3 * E + H * E + 3, 0:E].set(vecs)
    return wpack


def reference(keys, queries, values, Wk, Wq, Wv, Wd, bd, gamma, beta):
    """Pure-JAX mirror of SelfAttentionBlock.forward (dropout=identity, mask no-op)."""
    sa_keys, sa_queries, sa_values = queries, keys, values      # argument swap in the block
    N = sa_queries.shape[0]
    H, D, E = HEADS, HEAD_DIM, EMBED
    k3 = sa_keys.reshape(N, -1, H, D)
    q3 = sa_queries.reshape(N, -1, H, D)
    v3 = sa_values.reshape(N, -1, H, D)
    Kp = jnp.einsum('nlhd,ed->nlhe', k3, Wk)
    Qp = jnp.einsum('nlhd,ed->nlhe', q3, Wq)
    Vp = jnp.einsum('nlhd,ed->nlhe', v3, Wv)
    s = jnp.einsum('nqhe,nkhe->nhqk', Qp, Kp) / D ** 0.5
    attn = jax.nn.softmax(s, axis=3)
    o = jnp.einsum('nhqk,nkhe->nqhe', attn, Vp)
    o = o.reshape(N, -1, E)
    o = o @ Wd.T + bd
    o = o.reshape(N, o.shape[1] // H, H, E)
    att = o.mean(axis=2)
    x = att + values
    mu = x.mean(-1, keepdims=True)
    var = ((x - mu) ** 2).mean(-1, keepdims=True)
    return (x - mu) / jnp.sqrt(var + LN_EPS) * gamma + beta


if __name__ == "__main__":
    key = jax.random.PRNGKey(0)
    ks = jax.random.split(key, 8)

    keys_in = jax.random.normal(ks[0], (BATCH, SEQ, EMBED), jnp.float32)
    queries_in = jax.random.normal(ks[1], (BATCH, SEQ, EMBED), jnp.float32)
    values_in = jax.random.normal(ks[2], (BATCH, SEQ, EMBED), jnp.float32)

    # Deterministic parameter init (PyTorch-style uniform bounds).
    lim = 1.0 / math.sqrt(HEAD_DIM)
    Wk = jax.random.uniform(ks[3], (EMBED, HEAD_DIM), jnp.float32, -lim, lim)
    Wq = jax.random.uniform(ks[4], (EMBED, HEAD_DIM), jnp.float32, -lim, lim)
    Wv = jax.random.uniform(ks[5], (EMBED, HEAD_DIM), jnp.float32, -lim, lim)
    limd = 1.0 / math.sqrt(EMBED)
    Wd = jax.random.uniform(ks[6], (EMBED, EMBED), jnp.float32, -limd, limd)
    bd = jax.random.uniform(ks[7], (EMBED,), jnp.float32, -limd, limd)
    gamma = jnp.ones((EMBED,), jnp.float32)     # nn.LayerNorm default init
    beta = jnp.zeros((EMBED,), jnp.float32)

    wpack = pack_params(Wk, Wq, Wv, Wd, bd, gamma, beta)   # single packed constants operand

    out = self_attention_block(keys_in, queries_in, values_in, wpack, mask=None)
    out = jax.block_until_ready(out)

    ref = reference(keys_in, queries_in, values_in, Wk, Wq, Wv, Wd, bd, gamma, beta)
    err = float(jnp.max(jnp.abs(out - ref)))
    assert out.shape == (BATCH, SEQ, EMBED)
    # Tolerance slightly relaxed vs 1e-4 because the softmax uses the EUP approximate
    # reciprocal (rel. err ~2^-12); still a tight correctness check for O(1) outputs.
    assert jnp.allclose(out, ref, rtol=2e-3, atol=2e-3), f"max abs err = {err}"
    print("KERNEL_OK")
</pallas_src>

<mosaic_0001>
module attributes {stable_mosaic.version = 11 : i64} {
  func.func @_sab_kernel(%arg0: memref<3x16x32xf32, #tpu.memory_space<vmem>>, %arg1: memref<232x128xf32, #tpu.memory_space<vmem>>, %arg2: memref<16x32xf32, #tpu.memory_space<vmem>>) attributes {dimension_semantics = [], scalar_prefetch = 0 : i64, scratch_operands = 0 : i64, tpu.core_type = #tpu.core_type<tc>} {
    %c0 = arith.constant 0 : index
    %c0_0 = arith.constant 0 : index
    %c0_1 = arith.constant 0 : index
    %0 = vector.load %arg0[%c0, %c0_0, %c0_1] : memref<3x16x32xf32, #tpu.memory_space<vmem>>, vector<3x16x32xf32>
    %c0_2 = arith.constant 0 : index
    %c0_3 = arith.constant 0 : index
    %1 = vector.load %arg1[%c0_2, %c0_3] : memref<232x128xf32, #tpu.memory_space<vmem>>, vector<96x128xf32>
    %2 = vector.shape_cast %1 : vector<96x128xf32> to vector<3x32x128xf32>
    "tpu.trace_start"() <{level = 10 : i32, message = "bxe,bef->bxf"}> : () -> ()
    %cst = arith.constant dense<0.000000e+00> : vector<3x16x128xf32>
    %3 = tpu.matmul %0, %2, %cst {dimension_numbers = #tpu.dot_dimension_numbers<[2], [1], [1], [2], [0, 0, 0, 1, 1, 2], [0], [0]>} : vector<3x16x32xf32>, vector<3x32x128xf32>, vector<3x16x128xf32> -> vector<3x16x128xf32>
    "tpu.trace_stop"() : () -> ()
    %4 = vector.extract_strided_slice %3 {offsets = [0, 0, 0], sizes = [1, 16, 128], strides = [1, 1, 1]} : vector<3x16x128xf32> to vector<1x16x128xf32>
    %5 = vector.shape_cast %4 : vector<1x16x128xf32> to vector<16x128xf32>
    %6 = vector.shape_cast %5 : vector<16x128xf32> to vector<2x8x128xf32>
    %7 = vector.extract_strided_slice %6 {offsets = [0, 0, 0], sizes = [2, 8, 32], strides = [1, 1, 1]} : vector<2x8x128xf32> to vector<2x8x32xf32>
    %8 = vector.extract_strided_slice %6 {offsets = [0, 0, 32], sizes = [2, 8, 32], strides = [1, 1, 1]} : vector<2x8x128xf32> to vector<2x8x32xf32>
    %9 = vector.extract_strided_slice %6 {offsets = [0, 0, 64], sizes = [2, 8, 32], strides = [1, 1, 1]} : vector<2x8x128xf32> to vector<2x8x32xf32>
    %10 = vector.extract_strided_slice %6 {offsets = [0, 0, 96], sizes = [2, 8, 32], strides = [1, 1, 1]} : vector<2x8x128xf32> to vector<2x8x32xf32>
    %11 = tpu.concatenate %7, %8, %9, %10 in 0 : vector<2x8x32xf32>, vector<2x8x32xf32>, vector<2x8x32xf32>, vector<2x8x32xf32> -> vector<8x8x32xf32>
    %12 = vector.extract_strided_slice %3 {offsets = [1, 0, 0], sizes = [1, 16, 128], strides = [1, 1, 1]} : vector<3x16x128xf32> to vector<1x16x128xf32>
    %13 = vector.shape_cast %12 : vector<1x16x128xf32> to vector<16x128xf32>
    %14 = vector.shape_cast %13 : vector<16x128xf32> to vector<2x8x128xf32>
    %15 = vector.extract_strided_slice %14 {offsets = [0, 0, 0], sizes = [2, 8, 32], strides = [1, 1, 1]} : vector<2x8x128xf32> to vector<2x8x32xf32>
    %16 = vector.extract_strided_slice %14 {offsets = [0, 0, 32], sizes = [2, 8, 32], strides = [1, 1, 1]} : vector<2x8x128xf32> to vector<2x8x32xf32>
    %17 = vector.extract_strided_slice %14 {offsets = [0, 0, 64], sizes = [2, 8, 32], strides = [1, 1, 1]} : vector<2x8x128xf32> to vector<2x8x32xf32>
    %18 = vector.extract_strided_slice %14 {offsets = [0, 0, 96], sizes = [2, 8, 32], strides = [1, 1, 1]} : vector<2x8x128xf32> to vector<2x8x32xf32>
    %19 = tpu.concatenate %15, %16, %17, %18 in 0 : vector<2x8x32xf32>, vector<2x8x32xf32>, vector<2x8x32xf32>, vector<2x8x32xf32> -> vector<8x8x32xf32>
    %20 = vector.extract_strided_slice %3 {offsets = [2, 0, 0], sizes = [1, 16, 128], strides = [1, 1, 1]} : vector<3x16x128xf32> to vector<1x16x128xf32>
    %21 = vector.shape_cast %20 : vector<1x16x128xf32> to vector<16x128xf32>
    %22 = vector.shape_cast %21 : vector<16x128xf32> to vector<2x8x128xf32>
    %23 = vector.extract_strided_slice %22 {offsets = [0, 0, 0], sizes = [2, 8, 32], strides = [1, 1, 1]} : vector<2x8x128xf32> to vector<2x8x32xf32>
    %24 = vector.extract_strided_slice %22 {offsets = [0, 0, 32], sizes = [2, 8, 32], strides = [1, 1, 1]} : vector<2x8x128xf32> to vector<2x8x32xf32>
    %25 = vector.extract_strided_slice %22 {offsets = [0, 0, 64], sizes = [2, 8, 32], strides = [1, 1, 1]} : vector<2x8x128xf32> to vector<2x8x32xf32>
    %26 = vector.extract_strided_slice %22 {offsets = [0, 0, 96], sizes = [2, 8, 32], strides = [1, 1, 1]} : vector<2x8x128xf32> to vector<2x8x32xf32>
    %27 = tpu.concatenate %23, %24, %25, %26 in 0 : vector<2x8x32xf32>, vector<2x8x32xf32>, vector<2x8x32xf32>, vector<2x8x32xf32> -> vector<8x8x32xf32>
    "tpu.trace_start"() <{level = 10 : i32, message = "bqe,bke->bqk"}> : () -> ()
    %cst_4 = arith.constant dense<0.000000e+00> : vector<8x8x8xf32>
    %28 = tpu.matmul %19, %11, %cst_4 {dimension_numbers = #tpu.dot_dimension_numbers<[2], [2], [1], [1], [0, 0, 0, 1, 1, 1], [0], [0]>} : vector<8x8x32xf32>, vector<8x8x32xf32>, vector<8x8x8xf32> -> vector<8x8x8xf32>
    "tpu.trace_stop"() : () -> ()
    %cst_5 = arith.constant dense<0xFF800000> : vector<8x8xf32>
    %29 = vector.multi_reduction <maximumf>, %28, %cst_5 [2] : vector<8x8x8xf32> to vector<8x8xf32>
    %30 = vector.shape_cast %29 : vector<8x8xf32> to vector<8x8x1xf32>
    %31 = vector.broadcast %30 : vector<8x8x1xf32> to vector<8x8x8xf32>
    %32 = arith.subf %28, %31 : vector<8x8x8xf32>
    %33 = math.exp %32 : vector<8x8x8xf32>
    %cst_6 = arith.constant dense<0.000000e+00> : vector<8x8xf32>
    %34 = vector.multi_reduction <add>, %33, %cst_6 [2] : vector<8x8x8xf32> to vector<8x8xf32>
    %35 = vector.shape_cast %34 : vector<8x8xf32> to vector<8x8x1xf32>
    %36 = tpu.reciprocal %35 {approx = true} : vector<8x8x1xf32> -> vector<8x8x1xf32>
    %37 = vector.broadcast %36 : vector<8x8x1xf32> to vector<8x8x8xf32>
    %38 = arith.mulf %33, %37 : vector<8x8x8xf32>
    "tpu.trace_start"() <{level = 10 : i32, message = "bqk,bke->bqe"}> : () -> ()
    %cst_7 = arith.constant dense<0.000000e+00> : vector<8x8x32xf32>
    %39 = tpu.matmul %38, %27, %cst_7 {dimension_numbers = #tpu.dot_dimension_numbers<[2], [1], [1], [2], [0, 0, 0, 1, 1, 2], [0], [0]>} : vector<8x8x8xf32>, vector<8x8x32xf32>, vector<8x8x32xf32> -> vector<8x8x32xf32>
    "tpu.trace_stop"() : () -> ()
    %40 = vector.extract_strided_slice %39 {offsets = [0, 0, 0], sizes = [2, 8, 32], strides = [1, 1, 1]} : vector<8x8x32xf32> to vector<2x8x32xf32>
    %41 = vector.shape_cast %40 : vector<2x8x32xf32> to vector<16x32xf32>
    %42 = vector.extract_strided_slice %39 {offsets = [2, 0, 0], sizes = [2, 8, 32], strides = [1, 1, 1]} : vector<8x8x32xf32> to vector<2x8x32xf32>
    %43 = vector.shape_cast %42 : vector<2x8x32xf32> to vector<16x32xf32>
    %44 = vector.extract_strided_slice %39 {offsets = [4, 0, 0], sizes = [2, 8, 32], strides = [1, 1, 1]} : vector<8x8x32xf32> to vector<2x8x32xf32>
    %45 = vector.shape_cast %44 : vector<2x8x32xf32> to vector<16x32xf32>
    %46 = vector.extract_strided_slice %39 {offsets = [6, 0, 0], sizes = [2, 8, 32], strides = [1, 1, 1]} : vector<8x8x32xf32> to vector<2x8x32xf32>
    %47 = vector.shape_cast %46 : vector<2x8x32xf32> to vector<16x32xf32>
    %48 = tpu.concatenate %41, %43, %45, %47 in 1 : vector<16x32xf32>, vector<16x32xf32>, vector<16x32xf32>, vector<16x32xf32> -> vector<16x128xf32>
    %c96 = arith.constant 96 : index
    %c0_8 = arith.constant 0 : index
    %49 = vector.load %arg1[%c96, %c0_8] : memref<232x128xf32, #tpu.memory_space<vmem>>, vector<128x32xf32>
    %c224 = arith.constant 224 : index
    %c0_9 = arith.constant 0 : index
    %50 = vector.load %arg1[%c224, %c0_9] : memref<232x128xf32, #tpu.memory_space<vmem>>, vector<3x32xf32>
    %51 = vector.extract_strided_slice %50 {offsets = [0, 0], sizes = [1, 32], strides = [1, 1]} : vector<3x32xf32> to vector<1x32xf32>
    %52 = vector.extract_strided_slice %50 {offsets = [1, 0], sizes = [1, 32], strides = [1, 1]} : vector<3x32xf32> to vector<1x32xf32>
    %53 = vector.extract_strided_slice %50 {offsets = [2, 0], sizes = [1, 32], strides = [1, 1]} : vector<3x32xf32> to vector<1x32xf32>
    %cst_10 = arith.constant dense<0.000000e+00> : vector<16x32xf32>
    %54 = tpu.matmul %48, %49, %cst_10 {dimension_numbers = #tpu.dot_dimension_numbers<[1], [0], [0], [1], [0, 0, 1, 1], [], []>} : vector<16x128xf32>, vector<128x32xf32>, vector<16x32xf32> -> vector<16x32xf32>
    %55 = vector.broadcast %51 : vector<1x32xf32> to vector<16x32xf32>
    %56 = arith.addf %54, %55 : vector<16x32xf32>
    %57 = vector.extract_strided_slice %0 {offsets = [2, 0, 0], sizes = [1, 16, 32], strides = [1, 1, 1]} : vector<3x16x32xf32> to vector<1x16x32xf32>
    %58 = vector.shape_cast %57 : vector<1x16x32xf32> to vector<16x32xf32>
    %59 = arith.addf %56, %58 : vector<16x32xf32>
    %cst_11 = arith.constant dense<0.000000e+00> : vector<16xf32>
    %60 = vector.multi_reduction <add>, %59, %cst_11 [1] : vector<16x32xf32> to vector<16xf32>
    %61 = vector.shape_cast %60 : vector<16xf32> to vector<16x1xf32>
    %cst_12 = arith.constant 3.200000e+01 : f32
    %62 = vector.broadcast %cst_12 : f32 to vector<16x1xf32>
    %63 = arith.divf %61, %62 : vector<16x1xf32>
    %64 = vector.broadcast %63 : vector<16x1xf32> to vector<16x32xf32>
    %65 = arith.subf %59, %64 : vector<16x32xf32>
    %66 = arith.mulf %65, %65 : vector<16x32xf32>
    %cst_13 = arith.constant dense<0.000000e+00> : vector<16xf32>
    %67 = vector.multi_reduction <add>, %66, %cst_13 [1] : vector<16x32xf32> to vector<16xf32>
    %68 = vector.shape_cast %67 : vector<16xf32> to vector<16x1xf32>
    %cst_14 = arith.constant 3.200000e+01 : f32
    %69 = vector.broadcast %cst_14 : f32 to vector<16x1xf32>
    %70 = arith.divf %68, %69 : vector<16x1xf32>
    %71 = vector.broadcast %63 : vector<16x1xf32> to vector<16x32xf32>
    %72 = arith.subf %59, %71 : vector<16x32xf32>
    %cst_15 = arith.constant 9.99999974E-6 : f32
    %73 = vector.broadcast %cst_15 : f32 to vector<16x1xf32>
    %74 = arith.addf %70, %73 : vector<16x1xf32>
    %75 = math.rsqrt %74 : vector<16x1xf32>
    %76 = vector.broadcast %75 : vector<16x1xf32> to vector<16x32xf32>
    %77 = arith.mulf %72, %76 : vector<16x32xf32>
    %78 = vector.broadcast %52 : vector<1x32xf32> to vector<16x32xf32>
    %79 = arith.mulf %77, %78 : vector<16x32xf32>
    %80 = vector.broadcast %53 : vector<1x32xf32> to vector<16x32xf32>
    %81 = arith.addf %79, %80 : vector<16x32xf32>
    %c0_16 = arith.constant 0 : index
    %c0_17 = arith.constant 0 : index
    %82 = vector.load %arg2[%c0_16, %c0_17] : memref<16x32xf32, #tpu.memory_space<vmem>>, vector<16x32xf32>
    tpu.vector_store %arg2[%c0_16, %c0_17], %81 {strides = array<i32>} : memref<16x32xf32, #tpu.memory_space<vmem>>, vector<16x32xf32>,
    return
  }
}

</mosaic_0001>

<bundles_post_ra>
// kernel: self_attention_block.1
= control target key start
LH: loop header
LB: loop body
LE: loop exit
PB: predicated region body
PF: predicated region fallthrough
CT: control target
= control target key end

     0   :  { %7 = vsyncpa [#allocation3], 0  ;;  %s2422_s0 = inlined_call_operand.vmem [shape: f32[3,16,32], index: 0, kind: input, shape index: {}]   ;;  %s2423_s1 = inlined_call_operand.hbm [shape: f32[232,128], index: 1, kind: input, shape index: {}]   ;;  %s2424_s2 = inlined_call_operand.hbm [shape: f32[16,32], index: 2, kind: output, shape index: {}]  }
   0x1   :  { %8 = vsyncpa [#allocation4], 0  ;;  %s2199_s9 = smov [#allocation2]   ;;  %s2151_s13 = scalar_lea.hbm %s2423_s1, 3712 }
   0x2   :  { %s16_s10 = sshll.u32 %s2199_s9, 4  ;;  %p2152_p0 = scmp.ne.s32.totalorder %s2423_s1, %s2151_s13  ;;  %s17_s10 = int_to_ptr.vmem [resolvable:$true] %s16_s10 }
   0x3   :  { %p2155_p1 = scmp.lt.u32.totalorder %s2151_s13, %s2423_s1 }
   0x5   :  { %p2157_p2 = pnand %p2155_p1, %p2152_p0 }
   0x7   :  { %2160 = shalt.err (!%p2157_p2)
}
   0x8   :  { %s2161_s18 = scalar_lea.vmem %s17_s10, 3712  ;;  %p2166_p4 = scmp.lt.s32.totalorder %s17_s10, %s17_s10 }
   0x9   :  { %p2162_p3 = scmp.ne.s32.totalorder %s17_s10, %s2161_s18  ;;  %p2167_p5 = scmp.lt.s32.totalorder %s2161_s18, %s2161_s18 }
   0xb   :  { %p2168_p6 = por %p2167_p5, %p2166_p4 }
   0xd   :  { %p2169_p7 = pnand %p2168_p6, %p2162_p3 }
   0xf   :  { %2172 = shalt.err (!%p2169_p7)
}
  0x10   :  { %s2200_s19 = smov 128   ;;  %s2201_s20 = smov 8  }
  0x11   :  { %22 = dma.hbm_to_vmem [thread:$0]  %s2423_s1, 3712, %s17_s10, [#allocation3], %s2200_s19, %s2200_s19, %s2201_s20  }
  0x12   :  { %2195 = dma.done.wait [#allocation3], 3712  }
  0x13   :  { %2196 = vsyncadd [#allocation3], 4294963584  ;;  %vm44_vm0 = vcmask 261120   ;;  %v32_v0 = vld [vmem:[#allocation2] sm:$0xff]  ;;  %v33_v1 = vld [vmem:[#allocation2 + $0x8] sm:$0xff]  ;;  %v2202_v23 = vmov 0.0  }
  0x14   :  { %v34_v2 = vld [vmem:[#allocation2 + $0x10] sm:$0xff]  ;;  %v2035_v3 = vpack.c.bf16 %v33_v1, %v32_v0  ;;  %v35_v4 = vld [vmem:[#allocation2 + $0x18] sm:$0xff]  ;;  %v26_v5 = vld [vmem:[%s2422_s0] sm:$0xff]  ;;  %1930 = vmatprep.subr.mxu0 %v2202_v23  ;;  %vm2203_vm1 = vmmov 0   ;;  %s2204_s6 = smov 64   ;;  %s2205_s7 = smov 96  }
  0x15   :  { %v2039_v6 = vpack.c.bf16 %v35_v4, %v34_v2  ;;  %1895 = vmatprep.mubr.msk.f32.mxu1 %vm44_vm0, %v26_v5  ;;  %v36_v7 = vld [vmem:[#allocation2 + $0x20] sm:$0xff]  ;;  %v37_v8 = vld [vmem:[#allocation2 + $0x28] sm:$0xff]  ;;  %v38_v10 = vld [vmem:[#allocation2 + $0x30] sm:$0xff]  ;;  %1932 = vmatprep.mubr.msk.f32.mxu0 %vm2203_vm1, %v2202_v23  ;;  %vm928_vm2 = vcmask 64512   ;;  %vm1627_vm3 = vcmask 523264   ;;  %vm1630_vm4 = vcmask 785408  }
  0x16   :  { %2036 = vmatprep.subr.bf16.mxu1 %v2035_v3  ;;  %v2043_v9 = vpack.c.bf16 %v37_v8, %v36_v7  ;;  %v39_v11 = vld [vmem:[#allocation2 + $0x38] sm:$0xff]  ;;  %v27_v12 = vld [vmem:[%s2422_s0 + $0x8] sm:$0xff]  ;;  %v28_v14 = vld [vmem:[%s2422_s0 + $0x10] sm:$0xff]  ;;  %s2207_s8 = smov [#allocation5]  }
  0x17   :  { %2038 = vmatpush3.bf16.msra.mxu1 %v2035_v3  ;;  %v2047_v13 = vpack.c.bf16 %v39_v11, %v38_v10  ;;  %v40_v15 = vld [vmem:[#allocation2 + $0x40] sm:$0xff]  ;;  %v41_v16 = vld [vmem:[#allocation2 + $0x48] sm:$0xff]  ;;  %v42_v18 = vld [vmem:[#allocation2 + $0x50] sm:$0xff]  ;;  %s1777_s9 = sshll.u32 %s2207_s8, 4  ;;  %s1778_s9 = int_to_ptr.vmem [resolvable:$true] %s1777_s9 }
  0x18   :  { %2040 = vmatprep.subr.bf16.mxu1 %v2039_v6  ;;  %v2051_v17 = vpack.c.bf16 %v41_v16, %v40_v15  ;;  %v43_v19 = vld [vmem:[#allocation2 + $0x58] sm:$0xff]  ;;  %v2257_v22 = vld [vmem:[%s2422_s0 + $0x20] sm:$0xff]  ;;  %v2265_v24 = vld [vmem:[%s2422_s0 + $0x28] sm:$0xff]  ;;  %s2173_s10 = scalar_lea.vmem %s1778_s9, 256  ;;  %p2178_p9 = scmp.lt.s32.totalorder %s1778_s9, %s1778_s9 }
  0x19   :  { %v29_v20 = vld [vmem:[%s2422_s0 + $0x18] sm:$0xff]  ;;  %v2055_v21 = vpack.c.bf16 %v43_v19, %v42_v18  ;;  %s2206_s0 = smov 32   ;;  %p2174_p8 = scmp.ne.s32.totalorder %s1778_s9, %s2173_s10 }
  0x1a   :  { %p2179_p10 = scmp.lt.s32.totalorder %s2173_s10, %s2173_s10 }
  0x1b   :  { %2042 = vmatpush3.bf16.msra.mxu1 %v2039_v6 }
  0x1c   :  { %2044 = vmatprep.subr.bf16.mxu1 %v2043_v9  ;;  %p2180_p11 = por %p2179_p10, %p2178_p9 }
  0x1e   :  { %1896 = vmatmul.mubr.msk.f32.vlgmr.msra.gmra.mrb[0].mxu1 %vm44_vm0, %v27_v12  ;;  %p2181_p12 = pnand %p2180_p11, %p2174_p8 }
  0x1f   :  { %2046 = vmatpush3.bf16.msra.mxu1 %v2043_v9  ;;  %1906 = vmatprep.mubr.msk.f32.mxu1 %vm44_vm0, %v28_v14 }
  0x20   :  { %2048 = vmatprep.subr.bf16.mxu1 %v2047_v13 }
  0x23   :  { %2050 = vmatpush3.bf16.msra.mxu1 %v2047_v13 }
  0x24   :  { %2052 = vmatprep.subr.bf16.mxu1 %v2051_v17 }
  0x26   :  { %1907 = vmatmul.mubr.msk.f32.vlgmr.msra.gmra.mrb[2].mxu1 %vm44_vm0, %v29_v20 }
  0x27   :  { %2054 = vmatpush3.bf16.msra.mxu1 %v2051_v17  ;;  %1917 = vmatprep.mubr.msk.f32.mxu1 %vm44_vm0, %v2257_v22 }
  0x28   :  { %2056 = vmatprep.subr.bf16.mxu1 %v2055_v21 }
  0x2b   :  { %2058 = vmatpush3.bf16.msra.mxu1 %v2055_v21 }
  0x2c   :  { %1920 = vmatprep.subr.mxu1 %v2202_v23 }
  0x2e   :  { %1918 = vmatmul.mubr.msk.f32.vlgmr.msra.gmra.mrb[4].mxu1 %vm44_vm0, %v2265_v24 }
  0x2f   :  { %1922 = vmatprep.mubr.msk.f32.mxu1 %vm2203_vm1, %v2202_v23 }
  0xf1   :  { %v1897_v25 = vpop.f32.mrb[0].mxu1 }
  0xf2   :  { %296 = vrot.lane.b32.xlu1 %v1897_v25, %s2204_s6  ;;  %292 = vrot.lane.b32.xlu0 %v1897_v25, %s2205_s7  ;;  %v117_v26 = vpop.f32.mrb[1].mxu1 }
  0xf3   :  { %1921 = vmatpush3.xpose.msk.msra.mxu1 %vm44_vm0, %v117_v26 }
  0xf4   :  { %1925 = vmatprep.subr.mxu1 %v2202_v23 }
  0xf6   :  { %294 = vrot.lane.b32.xlu1 %v117_v26, %s2204_s6  ;;  %290 = vrot.lane.b32.xlu0 %v117_v26, %s2205_s7 }
  0xf9   :  { %v1908_v27 = vpop.f32.mrb[2].mxu1 }
  0xfa   :  { %306 = vrot.lane.b32.xlu0 %v1908_v27, %s2205_s7  ;;  %v198_v28 = vpop.f32.mrb[3].mxu1 }
  0xfb   :  { %304 = vrot.lane.b32.xlu1 %v198_v28, %s2205_s7  ;;  %1923 = vmatmul.mubr.msk.f32.vlgmr.msra.gmra.mrb[6].mxu1 %vm44_vm0, %v198_v28 }
  0xfc   :  { %1926 = vmatpush3.xpose.msk.msra.mxu1 %vm44_vm0, %v1897_v25  ;;  %1927 = vmatprep.mubr.msk.f32.mxu1 %vm2203_vm1, %v2202_v23 }
  0xfd   :  { %1935 = vmatprep.subr.mxu1 %v2202_v23 }
  0xfe   :  { %310 = vrot.lane.b32.xlu0 %v1908_v27, %s2204_s6 }
  0xff   :  { %298 = vrot.lane.b32.xlu1 %v117_v26, %s2206_s0  ;;  %1928 = vmatmul.mubr.msk.f32.vlgmr.msra.gmra.mrb[8].mxu1 %vm44_vm0, %v1908_v27 }
 0x100   :  { %1937 = vmatprep.mubr.msk.f32.mxu1 %vm2203_vm1, %v2202_v23 }
 0x101   :  { %v2296_v29 = vpop.f32.mrb[4].mxu1 }
 0x102   :  { %308 = vrot.lane.b32.xlu0 %v198_v28, %s2204_s6  ;;  %v2298_v30 = vpop.f32.mrb[5].mxu1 }
 0x103   :  { %300 = vrot.lane.b32.xlu1 %v1897_v25, %s2206_s0 }
 0x106   :  { %312 = vrot.lane.b32.xlu0 %v198_v28, %s2206_s0 }
 0x107   :  { %314 = vrot.lane.b32.xlu1 %v1908_v27, %s2206_s0 }
 0x164   :  { %v297_v31 = vpop.permute.xlu1 %296  ;;  %v293_v32 = vpop.permute.xlu0 %292 }
 0x165   :  { %1936 = vmatpush3.xpose.msk.msra.mxu1 %vm44_vm0, %v293_v32 }
 0x166   :  { %1945 = vmatprep.subr.mxu1 %v2202_v23 }
 0x168   :  { %v295_v33 = vpop.permute.xlu1 %294  ;;  %v291_v34 = vpop.permute.xlu0 %290 }
 0x169   :  { %1931 = vmatpush3.xpose.msk.msra.mxu0 %vm44_vm0, %v291_v34 }
 0x16a   :  { %1940 = vmatprep.subr.mxu0 %v2202_v23 }
 0x16c   :  { %v307_v35 = vpop.permute.xlu0 %306 }
 0x16d   :  { %v305_v36 = vpop.permute.xlu1 %304  ;;  %1938 = vmatmul.mubr.msk.f32.vlgmr.msra.gmra.mrb[10].mxu1 %vm44_vm0, %v307_v35 }
 0x16e   :  { %1946 = vmatpush3.xpose.msk.msra.mxu1 %vm44_vm0, %v297_v31  ;;  %1933 = vmatmul.mubr.msk.f32.vlgmr.msra.gmra.mrb[0].mxu0 %vm44_vm0, %v305_v36 }
 0x16f   :  { %1941 = vmatpush3.xpose.msk.msra.mxu0 %vm44_vm0, %v295_v33  ;;  %1947 = vmatprep.mubr.msk.f32.mxu1 %vm2203_vm1, %v2202_v23 }
 0x170   :  { %v311_v37 = vpop.permute.xlu0 %310  ;;  %1942 = vmatprep.mubr.msk.f32.mxu0 %vm2203_vm1, %v2202_v23  ;;  %1950 = vmatprep.subr.mxu0 %v2202_v23 }
 0x171   :  { %v299_v38 = vpop.permute.xlu1 %298  ;;  %1948 = vmatmul.mubr.msk.f32.vlgmr.msra.gmra.mrb[12].mxu1 %vm44_vm0, %v311_v37  ;;  %1955 = vmatprep.subr.mxu1 %v2202_v23 }
 0x172   :  { %1957 = vmatprep.mubr.msk.f32.mxu1 %vm2203_vm1, %v2202_v23 }
 0x174   :  { %v309_v39 = vpop.permute.xlu0 %308 }
 0x175   :  { %1943 = vmatmul.mubr.msk.f32.vlgmr.msra.gmra.mrb[2].mxu0 %vm44_vm0, %v309_v39  ;;  %v301_v40 = vpop.permute.xlu1 %300 }
 0x176   :  { %1951 = vmatpush3.xpose.msk.msra.mxu0 %vm44_vm0, %v299_v38  ;;  %1956 = vmatpush3.xpose.msk.msra.mxu1 %vm44_vm0, %v301_v40 }
 0x177   :  { %1952 = vmatprep.mubr.msk.f32.mxu0 %vm2203_vm1, %v2202_v23  ;;  %1960 = vmatprep.subr.mxu0 %v2202_v23 }
 0x178   :  { %v313_v41 = vpop.permute.xlu0 %312  ;;  %1965 = vmatprep.subr.mxu1 %v2202_v23 }
 0x179   :  { %1953 = vmatmul.mubr.msk.f32.vlgmr.msra.gmra.mrb[4].mxu0 %vm44_vm0, %v313_v41  ;;  %v315_v42 = vpop.permute.xlu1 %314 }
 0x17a   :  { %1958 = vmatmul.mubr.msk.f32.vlgmr.msra.gmra.mrb[14].mxu1 %vm44_vm0, %v315_v42  ;;  %1961 = vmatpush3.msra.mxu0 %v2298_v30 }
 0x17b   :  { %1966 = vmatpush3.msra.mxu1 %v2296_v29  ;;  %1967 = vmatprep.mubr.msk.f32.mxu1 %vm2203_vm1, %v2202_v23 }
 0x17c   :  { %1975 = vmatprep.subr.mxu1 %v2202_v23  ;;  %1962 = vmatprep.mubr.msk.f32.mxu0 %vm2203_vm1, %v2202_v23 }
 0x17d   :  { %1970 = vmatprep.subr.mxu0 %v2202_v23 }
 0x1ce   :  { %v406_v43 = vpop.f32.mrb[6].mxu1 }
 0x1cf   :  { %v1924_v44 = vpop.f32.mrb[7].mxu1  ;;  %v929_v45 = vsel %vm928_vm2, %v406_v43, -inf }
 0x1d0   :  { %930 = vmax.xlane.f32.xlu0 %v929_v45 }
 0x1d2   :  { %v480_v46 = vpop.f32.mrb[8].mxu1 }
 0x1d3   :  { %v1929_v47 = vpop.f32.mrb[9].mxu1  ;;  %v932_v48 = vsel %vm928_vm2, %v480_v46, -inf }
 0x1d4   :  { %933 = vmax.xlane.f32.xlu1 %v932_v48 }
 0x240   :  { %v628_v49 = vpop.f32.mrb[10].mxu1 }
 0x241   :  { %v554_v50 = vpop.f32.mrb[0].mxu0  ;;  %v1939_v51 = vpop.f32.mrb[11].mxu1  ;;  %v938_v56 = vsel %vm928_vm2, %v628_v49, -inf }
 0x242   :  { %v1934_v52 = vpop.f32.mrb[1].mxu0  ;;  %v935_v53 = vsel %vm928_vm2, %v554_v50, -inf }
 0x243   :  { %936 = vmax.xlane.f32.xlu0 %v935_v53 }
 0x244   :  { %v776_v54 = vpop.f32.mrb[12].mxu1 }
 0x245   :  { %v1949_v55 = vpop.f32.mrb[13].mxu1  ;;  %v944_v60 = vsel %vm928_vm2, %v776_v54, -inf }
 0x247   :  { %939 = vmax.xlane.f32.xlu0 %v938_v56 }
 0x248   :  { %v702_v57 = vpop.f32.mrb[2].mxu0 }
 0x249   :  { %v1944_v58 = vpop.f32.mrb[3].mxu0  ;;  %v941_v59 = vsel %vm928_vm2, %v702_v57, -inf }
 0x24a   :  { %942 = vmax.xlane.f32.xlu1 %v941_v59 }
 0x24b   :  { %945 = vmax.xlane.f32.xlu0 %v944_v60 }
 0x24c   :  { %v850_v61 = vpop.f32.mrb[4].mxu0 }
 0x24d   :  { %v1954_v62 = vpop.f32.mrb[5].mxu0  ;;  %v924_v63 = vpop.f32.mrb[14].mxu1  ;;  %v947_v0 = vsel %vm928_vm2, %v850_v61, -inf }
 0x24e   :  { %948 = vmax.xlane.f32.xlu1 %v947_v0  ;;  %v1959_v1 = vpop.f32.mrb[15].mxu1  ;;  %v950_v2 = vsel %vm928_vm2, %v924_v63, -inf }
 0x24f   :  { %951 = vmax.xlane.f32.xlu0 %v950_v2 }
 0x25d   :  { %v931_v5 = vpop.xlane.xlu0 %930 }
 0x25e   :  { %v953_v7 = vsub.f32 %v406_v43, %v931_v5 }
 0x25f   :  { %318 = vrot.lane.b32.xlu1 %v2298_v30, %s2205_s7 }
 0x260   :  { %v961_v8 = vmul.f32 1.442695, %v953_v7 }
 0x261   :  { %v934_v3 = vpop.xlane.xlu1 %933 }
 0x262   :  { %v954_v4 = vsub.f32 %v480_v46, %v934_v3 }
 0x263   :  { %324 = vrot.lane.b32.xlu1 %v2298_v30, %s2204_s6 }
 0x264   :  { %v963_v6 = vmul.f32 1.442695, %v954_v4 }
 0x265   :  { %320 = vrot.lane.b32.xlu0 %v2296_v29, %s2205_s7 }
 0x266   :  { %2115 = vpow2.f32 %v963_v6 }
 0x267   :  { %326 = vrot.lane.b32.xlu1 %v2296_v29, %s2204_s6  ;;  %2117 = vpow2.f32 %v961_v8 }
 0x270   :  { %v2116_v9 = vpop.eup %2115 }
 0x271   :  { %v980_v10 = vsel %vm928_vm2, %v2116_v9, 0.0  ;;  %v2118_v11 = vpop.eup %2117 }
 0x272   :  { %v977_v12 = vsel %vm928_vm2, %v2118_v11, 0.0 }
 0x284   :  { %981 = vadd.xlane.f32.xlu0 %v980_v10 }
 0x28b   :  { %978 = vadd.xlane.f32.xlu1 %v977_v12  ;;  %v1633_v12 = vld [vmem:[#allocation2 + $0x60] sm:$0xff] }
 0x2d0   :  { %v937_v13 = vpop.xlane.xlu0 %936 }
 0x2d1   :  { %v955_v14 = vsub.f32 %v554_v50, %v937_v13  ;;  %v1634_v13 = vld [vmem:[#allocation2 + $0x68] sm:$0xff] }
 0x2d3   :  { %v965_v15 = vmul.f32 1.442695, %v955_v14  ;;  %v1635_v14 = vld [vmem:[#allocation2 + $0x70] sm:$0xff] }
 0x2d4   :  { %v940_v16 = vpop.xlane.xlu0 %939 }
 0x2d5   :  { %2119 = vpow2.f32 %v965_v15  ;;  %v956_v17 = vsub.f32 %v628_v49, %v940_v16  ;;  %v2059_v15 = vpack.c.bf16 %v1634_v13, %v1633_v12  ;;  %v1636_v16 = vld [vmem:[#allocation2 + $0x78] sm:$0xff] }
 0x2d7   :  { %v967_v18 = vmul.f32 1.442695, %v956_v17  ;;  %v943_v19 = vpop.xlane.xlu1 %942  ;;  %v2063_v17 = vpack.c.bf16 %v1636_v16, %v1635_v14 }
 0x2d8   :  { %v957_v20 = vsub.f32 %v702_v57, %v943_v19  ;;  %v946_v21 = vpop.xlane.xlu0 %945  ;;  %v1638_v19 = vld [vmem:[#allocation2 + $0x88] sm:$0xff] }
 0x2d9   :  { %2121 = vpow2.f32 %v967_v18  ;;  %v958_v25 = vsub.f32 %v776_v54, %v946_v21  ;;  %v1637_v18 = vld [vmem:[#allocation2 + $0x80] sm:$0xff]  ;;  %v1639_v21 = vld [vmem:[#allocation2 + $0x90] sm:$0xff] }
 0x2da   :  { %v969_v26 = vmul.f32 1.442695, %v957_v20  ;;  %v2067_v20 = vpack.c.bf16 %v1638_v19, %v1637_v18 }
 0x2db   :  { %v971_v27 = vmul.f32 1.442695, %v958_v25  ;;  %v949_v28 = vpop.xlane.xlu1 %948  ;;  %v1640_v25 = vld [vmem:[#allocation2 + $0x98] sm:$0xff] }
 0x2dc   :  { %2123 = vpow2.f32 %v969_v26  ;;  %v959_v31 = vsub.f32 %v850_v61, %v949_v28  ;;  %v952_v32 = vpop.xlane.xlu0 %951  ;;  %v1641_v26 = vld [vmem:[#allocation2 + $0xa0] sm:$0xff] }
 0x2dd   :  { %2125 = vpow2.f32 %v971_v27  ;;  %v960_v33 = vsub.f32 %v924_v63, %v952_v32  ;;  %v1642_v27 = vld [vmem:[#allocation2 + $0xa8] sm:$0xff] }
 0x2de   :  { %v973_v34 = vmul.f32 1.442695, %v959_v31  ;;  %v2075_v28 = vpack.c.bf16 %v1642_v27, %v1641_v26 }
 0x2df   :  { %v2120_v35 = vpop.eup %2119  ;;  %v975_v36 = vmul.f32 1.442695, %v960_v33  ;;  %v319_v48 = vpop.permute.xlu1 %318 }
 0x2e0   :  { %2127 = vpow2.f32 %v973_v34  ;;  %v983_v37 = vsel %vm928_vm2, %v2120_v35, 0.0  ;;  %v321_v49 = vpop.permute.xlu0 %320 }
 0x2e1   :  { %2129 = vpow2.f32 %v975_v36  ;;  %984 = vadd.xlane.f32.xlu1 %v983_v37  ;;  %v1644_v36 = vld [vmem:[#allocation2 + $0xb8] sm:$0xff] }
 0x2e3   :  { %v2122_v38 = vpop.eup %2121  ;;  %v325_v50 = vpop.permute.xlu1 %324 }
 0x2e4   :  { %v986_v39 = vsel %vm928_vm2, %v2122_v38, 0.0 }
 0x2e5   :  { %987 = vadd.xlane.f32.xlu0 %v986_v39  ;;  %v1646_v39 = vld [vmem:[#allocation2 + $0xc8] sm:$0xff] }
 0x2e6   :  { %v2124_v40 = vpop.eup %2123 }
 0x2e7   :  { %v2126_v41 = vpop.eup %2125  ;;  %v989_v42 = vsel %vm928_vm2, %v2124_v40, 0.0  ;;  %v327_v52 = vpop.permute.xlu1 %326 }
 0x2e8   :  { %990 = vadd.xlane.f32.xlu1 %v989_v42  ;;  %v992_v43 = vsel %vm928_vm2, %v2126_v41, 0.0  ;;  %v1647_v42 = vld [vmem:[#allocation2 + $0xd0] sm:$0xff] }
 0x2e9   :  { %993 = vadd.xlane.f32.xlu0 %v992_v43  ;;  %v1648_v43 = vld [vmem:[#allocation2 + $0xd8] sm:$0xff] }
 0x2ea   :  { %v2356_v44 = vpop.eup %2127 }
 0x2eb   :  { %v2358_v45 = vpop.eup %2129  ;;  %v995_v46 = vsel %vm928_vm2, %v2356_v44, 0.0 }
 0x2ec   :  { %996 = vadd.xlane.f32.xlu1 %v995_v46  ;;  %v998_v47 = vsel %vm928_vm2, %v2358_v45, 0.0 }
 0x2ed   :  { %999 = vadd.xlane.f32.xlu0 %v998_v47 }
 0x2fd   :  { %332 = vrot.lane.b32.xlu1 %v2296_v29, %s2206_s0 }
 0x303   :  { %330 = vrot.lane.b32.xlu0 %v2298_v30, %s2206_s0 }
 0x311   :  { %v982_v51 = vpop.xlane.xlu0 %981 }
 0x312   :  { %2131 = vrcp.f32 %v982_v51 }
 0x318   :  { %v979_v53 = vpop.xlane.xlu1 %978 }
 0x319   :  { %2133 = vrcp.f32 %v979_v53 }
 0x31c   :  { %v2132_v54 = vpop.eup %2131 }
 0x31d   :  { %v1010_v55 = vmul.f32 %v2132_v54, %v2116_v9 }
 0x31f   :  { %1968 = vmatmul.mubr.msk.f32.vlgmr.msra.gmra.mrb[16].mxu1 %vm928_vm2, %v1010_v55 }
 0x320   :  { %1976 = vmatpush3.msra.mxu1 %v321_v49  ;;  %1977 = vmatprep.mubr.msk.f32.mxu1 %vm2203_vm1, %v2202_v23 }
 0x321   :  { %1985 = vmatprep.subr.mxu1 %v2202_v23 }
 0x323   :  { %v2134_v29 = vpop.eup %2133 }
 0x324   :  { %v1009_v30 = vmul.f32 %v2134_v29, %v2118_v11 }
 0x326   :  { %1963 = vmatmul.mubr.msk.f32.vlgmr.msra.gmra.mrb[6].mxu0 %vm928_vm2, %v1009_v30 }
 0x327   :  { %1971 = vmatpush3.msra.mxu0 %v319_v48  ;;  %1972 = vmatprep.mubr.msk.f32.mxu0 %vm2203_vm1, %v2202_v23 }
 0x328   :  { %1980 = vmatprep.subr.mxu0 %v2202_v23 }
 0x36e   :  { %v985_v56 = vpop.xlane.xlu1 %984 }
 0x36f   :  { %2135 = vrcp.f32 %v985_v56 }
 0x372   :  { %v988_v57 = vpop.xlane.xlu0 %987 }
 0x373   :  { %2137 = vrcp.f32 %v988_v57 }
 0x375   :  { %v991_v58 = vpop.xlane.xlu1 %990 }
 0x376   :  { %2139 = vrcp.f32 %v991_v58  ;;  %v994_v59 = vpop.xlane.xlu0 %993 }
 0x377   :  { %2141 = vrcp.f32 %v994_v59 }
 0x379   :  { %v2136_v60 = vpop.eup %2135  ;;  %v997_v61 = vpop.xlane.xlu1 %996 }
 0x37a   :  { %v1011_v62 = vmul.f32 %v2136_v60, %v2120_v35  ;;  %2143 = vrcp.f32 %v997_v61  ;;  %v1000_v63 = vpop.xlane.xlu0 %999  ;;  %v1643_v35 = vld [vmem:[#allocation2 + $0xb0] sm:$0xff] }
 0x37b   :  { %2145 = vrcp.f32 %v1000_v63  ;;  %v2079_v37 = vpack.c.bf16 %v1644_v36, %v1643_v35 }
 0x37c   :  { %1973 = vmatmul.mubr.msk.f32.vlgmr.msra.gmra.mrb[8].mxu0 %vm928_vm2, %v1011_v62 }
 0x37d   :  { %v2138_v0 = vpop.eup %2137  ;;  %1981 = vmatpush3.msra.mxu0 %v325_v50  ;;  %1982 = vmatprep.mubr.msk.f32.mxu0 %vm2203_vm1, %v2202_v23  ;;  %v333_v8 = vpop.permute.xlu1 %332 }
 0x37e   :  { %v1012_v1 = vmul.f32 %v2138_v0, %v2122_v38  ;;  %1990 = vmatprep.subr.mxu0 %v2202_v23  ;;  %v331_v6 = vpop.permute.xlu0 %330  ;;  %v1645_v38 = vld [vmem:[#allocation2 + $0xc0] sm:$0xff] }
 0x380   :  { %v2140_v2 = vpop.eup %2139  ;;  %1978 = vmatmul.mubr.msk.f32.vlgmr.msra.gmra.mrb[18].mxu1 %vm928_vm2, %v1012_v1 }
 0x381   :  { %v2142_v3 = vpop.eup %2141  ;;  %v1013_v4 = vmul.f32 %v2140_v2, %v2124_v40  ;;  %1986 = vmatpush3.msra.mxu1 %v327_v52  ;;  %1987 = vmatprep.mubr.msk.f32.mxu1 %vm2203_vm1, %v2202_v23  ;;  %v2083_v40 = vpack.c.bf16 %v1646_v39, %v1645_v38 }
 0x382   :  { %v1014_v5 = vmul.f32 %v2142_v3, %v2126_v41  ;;  %1995 = vmatprep.subr.mxu1 %v2202_v23 }
 0x383   :  { %1983 = vmatmul.mubr.msk.f32.vlgmr.msra.gmra.mrb[10].mxu0 %vm928_vm2, %v1013_v4 }
 0x384   :  { %v2144_v7 = vpop.eup %2143  ;;  %1991 = vmatpush3.msra.mxu0 %v331_v6  ;;  %1988 = vmatmul.mubr.msk.f32.vlgmr.msra.gmra.mrb[20].mxu1 %vm928_vm2, %v1014_v5 }
 0x385   :  { %v2146_v9 = vpop.eup %2145  ;;  %v1015_v10 = vmul.f32 %v2144_v7, %v2356_v44  ;;  %1996 = vmatpush3.msra.mxu1 %v333_v8  ;;  %1992 = vmatprep.mubr.msk.f32.mxu0 %vm2203_vm1, %v2202_v23  ;;  %v1650_v8 = vlaneseq }
 0x386   :  { %v1016_v11 = vmul.f32 %v2146_v9, %v2358_v45  ;;  %1997 = vmatprep.mubr.msk.f32.mxu1 %vm2203_vm1, %v2202_v23  ;;  %2060 = vmatprep.subr.bf16.mxu0 %v2059_v15  ;;  %v2071_v23 = vpack.c.bf16 %v1640_v25, %v1639_v21  ;;  %v2087_v45 = vpack.c.bf16 %v1648_v43, %v1647_v42 }
 0x387   :  { %1993 = vmatmul.mubr.msk.f32.vlgmr.msra.gmra.mrb[12].mxu0 %vm928_vm2, %v1015_v10  ;;  %v1651_v9 = vshrl.u32 %v1650_v8, 7 }
 0x388   :  { %1998 = vmatmul.mubr.msk.f32.vlgmr.msra.gmra.mrb[22].mxu1 %vm928_vm2, %v1016_v11  ;;  %2062 = vmatpush3.bf16.msra.mxu0 %v2059_v15  ;;  %v1649_v11 = vld [vmem:[#allocation2 + $0xe0] sm:$0x7] }
 0x389   :  { %2064 = vmatprep.subr.bf16.mxu0 %v2063_v17  ;;  %v1652_v10 = vsub.s32 0, %v1651_v9  ;;  %v1760_v39 = vsub.s32 1, %v1651_v9 }
 0x38b   :  { %v1653_v12 = vrot.slane %v1649_v11, %v1652_v10 }
 0x38c   :  { %2066 = vmatpush3.bf16.msra.mxu0 %v2063_v17 }
 0x38d   :  { %2068 = vmatprep.subr.bf16.mxu0 %v2067_v20 }
 0x390   :  { %2070 = vmatpush3.bf16.msra.mxu0 %v2067_v20 }
 0x391   :  { %2072 = vmatprep.subr.bf16.mxu0 %v2071_v23 }
 0x394   :  { %2074 = vmatpush3.bf16.msra.mxu0 %v2071_v23 }
 0x395   :  { %2076 = vmatprep.subr.bf16.mxu0 %v2075_v28 }
 0x398   :  { %2078 = vmatpush3.bf16.msra.mxu0 %v2075_v28 }
 0x399   :  { %2080 = vmatprep.subr.bf16.mxu0 %v2079_v37 }
 0x39c   :  { %2082 = vmatpush3.bf16.msra.mxu0 %v2079_v37 }
 0x39d   :  { %2084 = vmatprep.subr.bf16.mxu0 %v2083_v40 }
 0x3a0   :  { %2086 = vmatpush3.bf16.msra.mxu0 %v2083_v40  ;;  %v1766_v40 = vsub.s32 2, %v1651_v9 }
 0x3a1   :  { %2088 = vmatprep.subr.bf16.mxu0 %v2087_v45 }
 0x3a4   :  { %2090 = vmatpush3.bf16.msra.mxu0 %v2087_v45 }
 0x3f2   :  { %v1159_v31 = vpop.f32.mrb[16].mxu1 }
 0x3f3   :  { %v1969_v32 = vpop.f32.mrb[17].mxu1 }
 0x3f9   :  { %v1086_v33 = vpop.f32.mrb[6].mxu0 }
 0x3fa   :  { %v1964_v34 = vpop.f32.mrb[7].mxu0 }
 0x44f   :  { %v1232_v41 = vpop.f32.mrb[8].mxu0 }
 0x450   :  { %v1974_v44 = vpop.f32.mrb[9].mxu0 }
 0x451   :  { %v1767_v44 = vrot.slane %v1649_v11, %v1766_v40 }
 0x453   :  { %v1305_v46 = vpop.f32.mrb[18].mxu1 }
 0x454   :  { %v2100_v47 = vpack.i.bf16 %v1305_v46, %v1232_v41  ;;  %v1979_v48 = vpop.f32.mrb[19].mxu1  ;;  %v1761_v41 = vrot.slane %v1649_v11, %v1760_v39 }
 0x456   :  { %v1378_v49 = vpop.f32.mrb[10].mxu0  ;;  %2101 = vrot.lane.b32.xlu0 %v2100_v47, %s2206_s0 }
 0x457   :  { %v1984_v50 = vpop.f32.mrb[11].mxu0  ;;  %v1451_v51 = vpop.f32.mrb[20].mxu1 }
 0x458   :  { %v2105_v52 = vpack.i.bf16 %v1451_v51, %v1378_v49  ;;  %v1989_v53 = vpop.f32.mrb[21].mxu1 }
 0x45a   :  { %v1524_v54 = vpop.f32.mrb[12].mxu0  ;;  %2106 = vrot.lane.b32.xlu1 %v2105_v52, %s2204_s6 }
 0x45b   :  { %v1994_v55 = vpop.f32.mrb[13].mxu0  ;;  %v1597_v29 = vpop.f32.mrb[22].mxu1 }
 0x45c   :  { %v2110_v30 = vpack.i.bf16 %v1597_v29, %v1524_v54  ;;  %v1999_v56 = vpop.f32.mrb[23].mxu1 }
 0x45e   :  { %2111 = vrot.lane.b32.xlu0 %v2110_v30, %s2205_s7 }
 0x4c8   :  { %v2102_v57 = vpop.permute.xlu0 %2101 }
 0x4c9   :  { %v2104_v59 = vunpack.i.h.bf16 %v2102_v57  ;;  %v2103_v60 = vunpack.i.l.bf16 %v2102_v57 }
 0x4cb   :  { %v1626_v0 = vsel %vm44_vm0, %v1159_v31, %v2104_v59  ;;  %v1625_v3 = vsel %vm44_vm0, %v1086_v33, %v2103_v60 }
 0x4cc   :  { %v2107_v58 = vpop.permute.xlu1 %2106 }
 0x4cd   :  { %v2109_v61 = vunpack.i.h.bf16 %v2107_v58  ;;  %v2108_v62 = vunpack.i.l.bf16 %v2107_v58 }
 0x4cf   :  { %v1628_v4 = vsel %vm1627_vm3, %v1625_v3, %v2108_v62  ;;  %v1629_v5 = vsel %vm1627_vm3, %v1626_v0, %v2109_v61 }
 0x4d0   :  { %v2112_v63 = vpop.permute.xlu0 %2111 }
 0x4d1   :  { %v2114_v1 = vunpack.i.h.bf16 %v2112_v63  ;;  %v2113_v2 = vunpack.i.l.bf16 %v2112_v63 }
 0x4d3   :  { %v1631_v6 = vsel %vm1630_vm4, %v1628_v4, %v2113_v2  ;;  %v1632_v7 = vsel %vm1630_vm4, %v1629_v5, %v2114_v1 }
 0x4d4   :  { %2032 = vmatprep.mubr.f32.mxu0 %v1631_v6 }
 0x4d5   :  { %2033 = vmatmul.mubr.f32.vlgmr.msra.gmra.mrb[14].mxu0 %v1632_v7 }
 0x5a8   :  { %v2034_v13 = vpop.f32.mrb[14].mxu0 }
 0x5a9   :  { %v1726_v14 = vadd.f32 %v2034_v13, %v1653_v12  ;;  %v1720_v15 = vpop.f32.mrb[15].mxu0 }
 0x5aa   :  { %v1721_v16 = vadd.f32 %v1720_v15, %v1653_v12 }
 0x5ab   :  { %v1730_v17 = vadd.f32 %v1726_v14, %v2265_v24 }
 0x5ac   :  { %v1729_v18 = vadd.f32 %v1721_v16, %v2257_v22 }
 0x5ad   :  { %v1734_v19 = vsel %vm44_vm0, %v1730_v17, 0.0 }
 0x5ae   :  { %1735 = vadd.xlane.f32.xlu0 %v1734_v19  ;;  %v1731_v20 = vsel %vm44_vm0, %v1729_v18, 0.0 }
 0x5af   :  { %1732 = vadd.xlane.f32.xlu1 %v1731_v20 }
 0x63b   :  { %v1736_v21 = vpop.xlane.xlu0 %1735 }
 0x63c   :  { %v1739_v25 = vmul.f32 0.03125, %v1736_v21  ;;  %v1733_v23 = vpop.xlane.xlu1 %1732 }
 0x63d   :  { %v1738_v26 = vmul.f32 0.03125, %v1733_v23 }
 0x63e   :  { %v1741_v27 = vsub.f32 %v1730_v17, %v1739_v25 }
 0x63f   :  { %v1740_v28 = vsub.f32 %v1729_v18, %v1738_v26 }
 0x640   :  { %v1743_v31 = vmul.f32 %v1741_v27, %v1741_v27 }
 0x641   :  { %v1742_v32 = vmul.f32 %v1740_v28, %v1740_v28 }
 0x642   :  { %v1747_v33 = vsel %vm44_vm0, %v1743_v31, 0.0 }
 0x643   :  { %1748 = vadd.xlane.f32.xlu1 %v1747_v33  ;;  %v1744_v24 = vsel %vm44_vm0, %v1742_v32, 0.0 }
 0x644   :  { %1745 = vadd.xlane.f32.xlu0 %v1744_v24 }
 0x6d0   :  { %v1749_v22 = vpop.xlane.xlu1 %1748 }
 0x6d1   :  { %v1751_v34 = vmul.f32 0.03125, %v1749_v22  ;;  %v1746_v35 = vpop.xlane.xlu0 %1745 }
 0x6d2   :  { %v1750_v36 = vmul.f32 0.03125, %v1746_v35 }
 0x6d3   :  { %v1753_v37 = vadd.f32 1e-05, %v1751_v34 }
 0x6d4   :  { %v1752_v38 = vadd.f32 1e-05, %v1750_v36 }
 0x6d5   :  { %2147 = vrsqrt.f32 %v1753_v37 }
 0x6d6   :  { %2149 = vrsqrt.f32 %v1752_v38 }
 0x6df   :  { %v2148_v42 = vpop.eup %2147 }
 0x6e0   :  { %v2150_v43 = vpop.eup %2149  ;;  %v1757_v45 = vmul.f32 %v2148_v42, %v1741_v27 }
 0x6e1   :  { %v1756_v46 = vmul.f32 %v2150_v43, %v1740_v28 }
 0x6e2   :  { %v1763_v47 = vmul.f32 %v1761_v41, %v1757_v45 }
 0x6e3   :  { %v1762_v48 = vmul.f32 %v1761_v41, %v1756_v46 }
 0x6e4   :  { %v1769_v49 = vadd.f32 %v1767_v44, %v1763_v47 }
 0x6e5   :  { %v1768_v50 = vadd.f32 %v1767_v44, %v1762_v48 }
 0x6e6   :  { %1771 = vst.msk [vmem:[#allocation5 + $0x8] sm:$0xff] %vm44_vm0, %v1769_v49 }
 0x6e7   :  { %1770 = vst.msk [vmem:[#allocation5] sm:$0xff] %vm44_vm0, %v1768_v50 }
 0x6e8   :  { %2184 = shalt.err (!%p2181_p12)
}
 0x6e9   :  { %s2185_s13 = scalar_lea.hbm %s2424_s2, 256 }
 0x6ea   :  { %p2186_p13 = scmp.ne.s32.totalorder %s2424_s2, %s2185_s13  ;;  %p2189_p0 = scmp.lt.u32.totalorder %s2185_s13, %s2424_s2 }
 0x6ec   :  { %p2191_p1 = pnand %p2189_p0, %p2186_p13 }
 0x6ee   :  { %2194 = shalt.err (!%p2191_p1)
}
 0x6ef   :  { %1783 = dma.vmem_to_hbm [thread:$0]  %s1778_s9, 256, %s2424_s2, [#allocation4], %s2200_s19, %s2200_s19, %s2201_s20  }
 0x6f0   :  { %2197 = dma.done.wait [#allocation4], 256  }
 0x6f1   :  { %2198 = vsyncadd [#allocation4], 4294967040 }
 0x6f2   :  { %1787 = vsyncpa [#allocation3], 1 }
 0x6f3   :  { %1788 = vsyncpa [#allocation4], 1 }

</bundles_post_ra>
